<compile_context>
chip_gen: v7x
topology: tpu7x:2x2x1
jax: 0.10.0
libtpu: 0.0.40
codegen_flags: <defaults>
</compile_context>

<pallas_src>
import functools

import jax
import jax.numpy as jnp
from jax.experimental import pallas as pl
from jax.experimental.pallas import tpu as pltpu

_LANES = 128
_SUBLANES = 8


def _soft_dice_partials_kernel(logits_ref, targets_ref, inter_ref, denom_ref,
                               *, tail_valid_rows):
    """Grid = (sample, chunk).  The chunk axis reduces the flattened spatial dim.

    Outputs are per-sample (8,128) vector partial sums of intersection (p*t) and
    denominator (p+t); they stay resident in VMEM across the chunk axis and the
    final scalar reduction + dice formula are done in the JAX wrapper.
    """
    k = pl.program_id(1)
    last = pl.num_programs(1) - 1

    @pl.when(k == 0)
    def _():
        inter_ref[...] = jnp.zeros_like(inter_ref)
        denom_ref[...] = jnp.zeros_like(denom_ref)

    block_rows = logits_ref.shape[1]

    def _accumulate(row_limit):
        x = logits_ref[...].astype(jnp.float32)       # (1, block_rows, 128)
        t = targets_ref[...].astype(jnp.float32)      # (1, block_rows, 128)
        # sigmoid(x) == 0.5*(tanh(0.5*x) + 1): one EUP transcendental per element.
        p = 0.5 * (jnp.tanh(0.5 * x) + 1.0)
        if row_limit is not None:
            # Mask rows past the real data (last, ragged chunk only). The masked
            # region may contain unspecified HBM data (even NaN); the selects
            # zero it out before it can reach the accumulators.
            rid = jax.lax.broadcasted_iota(jnp.int32, (1, block_rows, _LANES), 1)
            keep = rid < row_limit
            p = jnp.where(keep, p, 0.0)
            t = jnp.where(keep, t, 0.0)
        # Tile-preserving reshape + sum over the leading axis = pure vreg-wise
        # VPU adds (no XLU cross-lane work in the steady state).
        inter_ref[...] += (p * t).reshape(1, -1, _SUBLANES, _LANES).sum(axis=1)
        denom_ref[...] += (p + t).reshape(1, -1, _SUBLANES, _LANES).sum(axis=1)

    if tail_valid_rows is None:
        _accumulate(None)              # every chunk is full: fully unmasked
    else:
        @pl.when(k != last)
        def _():
            _accumulate(None)          # hot path: unmasked

        @pl.when(k == last)
        def _():
            _accumulate(tail_valid_rows)   # ragged tail: masked


def _pick_max_block_rows():
    """Generation-aware reduction tile height (rows of 128 lanes)."""
    try:
        kind = jax.devices()[0].device_kind.lower()
    except Exception:
        return 2048
    if "v7" in kind:
        return 8192    # ~4 MiB f32 logits/block: DMA >> step overhead at 3.2 TB/s
    if "v6" in kind:
        return 4096
    return 2048        # v5e: already HBM-bound at ~1 MiB/step


@functools.partial(jax.jit,
                   static_argnames=("smooth", "reduction", "max_block_rows"))
def soft_dice_loss(logits, targets, *, smooth=1.0, reduction="mean",
                   max_block_rows=None):
    """Matches SoftDiceLoss.forward semantics."""
    if logits.ndim != 4 or logits.shape[1] != 1:
        raise ValueError("logits must be of shape (N, 1, H, W).")
    if targets.ndim == 3:
        targets = targets[:, None, :, :]
    if targets.shape != logits.shape:
        raise ValueError("targets must match logits shape (N, 1, H, W) or (N, H, W).")
    # Keep targets narrow over HBM; cast to f32 inside the kernel.
    if targets.dtype == jnp.bool_:
        targets = targets.astype(jnp.int8)

    N = logits.shape[0]
    HW = int(logits.shape[1] * logits.shape[2] * logits.shape[3])

    if max_block_rows is None:
        max_block_rows = _pick_max_block_rows()
    max_block_rows = max(_SUBLANES, (max_block_rows // _SUBLANES) * _SUBLANES)

    # Pad only to a single (8,128) tile (<= 1023 extra elements). For any HW that
    # is a multiple of 1024 (224x224, 480x640, 512x512, ...) this is a no-op.
    tile = _SUBLANES * _LANES
    HW_padded = -(-HW // tile) * tile
    rows = HW_padded // _LANES                 # multiple of 8

    logits_flat = logits.reshape(N, HW)
    targets_flat = targets.reshape(N, HW)
    if HW_padded != HW:
        pad = HW_padded - HW
        # logits pad -> large negative so sigmoid(pad) == 0 exactly; targets pad -> 0.
        logits_flat = jnp.pad(logits_flat, ((0, 0), (0, pad)),
                              constant_values=-1e30)
        targets_flat = jnp.pad(targets_flat, ((0, 0), (0, pad)),
                               constant_values=0)

    logits_3d = logits_flat.reshape(N, rows, _LANES)
    targets_3d = targets_flat.reshape(N, rows, _LANES)

    block_rows = min(rows, max_block_rows)
    n_chunks = -(-rows // block_rows)
    tail_rows = rows - (n_chunks - 1) * block_rows
    tail_valid_rows = None if tail_rows == block_rows else tail_rows

    # TODO(synk): for N == 1 on v7x (2 TensorCores), add a second "parallel" grid
    # axis that splits the chunk range (emitting per-core partials) so both cores
    # stream HBM; with N >= 2 the existing parallel sample axis already covers it.

    kernel = functools.partial(_soft_dice_partials_kernel,
                               tail_valid_rows=tail_valid_rows)

    inter_p, denom_p = pl.pallas_call(
        kernel,
        out_shape=(
            jax.ShapeDtypeStruct((N, _SUBLANES, _LANES), jnp.float32),
            jax.ShapeDtypeStruct((N, _SUBLANES, _LANES), jnp.float32),
        ),
        grid_spec=pltpu.PrefetchScalarGridSpec(
            num_scalar_prefetch=0,
            grid=(N, n_chunks),
            in_specs=[
                pl.BlockSpec((1, block_rows, _LANES), lambda n, k: (n, k, 0)),
                pl.BlockSpec((1, block_rows, _LANES), lambda n, k: (n, k, 0)),
            ],
            out_specs=[
                pl.BlockSpec((1, _SUBLANES, _LANES), lambda n, k: (n, 0, 0)),
                pl.BlockSpec((1, _SUBLANES, _LANES), lambda n, k: (n, 0, 0)),
            ],
        ),
        compiler_params=pltpu.CompilerParams(
            dimension_semantics=("parallel", "arbitrary")),
    )(logits_3d, targets_3d)

    # Final cross-lane reduction + dice formula on N*1024 floats (negligible).
    inter = inter_p.reshape(N, -1).sum(axis=1)
    denom = denom_p.reshape(N, -1).sum(axis=1)
    dice = (2.0 * inter + smooth) / (denom + smooth)
    dice_loss = 1.0 - dice

    if reduction == "mean":
        return dice_loss.mean()
    elif reduction == "sum":
        return dice_loss.sum()
    elif reduction == "none":
        return dice_loss
    else:
        raise ValueError(f"Unsupported reduction mode: {reduction}")


def _soft_dice_loss_ref(logits, targets, smooth=1.0, reduction="mean"):
    # Pure-JAX reference for correctness checks.
    if targets.ndim == 3:
        targets = targets[:, None, :, :]
    targets = targets.astype(jnp.float32)
    p = jax.nn.sigmoid(logits.astype(jnp.float32))
    N = p.shape[0]
    pf = p.reshape(N, -1)
    tf = targets.reshape(N, -1)
    inter = (pf * tf).sum(axis=1)
    denom = pf.sum(axis=1) + tf.sum(axis=1)
    loss = 1.0 - (2.0 * inter + smooth) / (denom + smooth)
    if reduction == "mean":
        return loss.mean()
    if reduction == "sum":
        return loss.sum()
    return loss


if __name__ == "__main__":
    key = jax.random.PRNGKey(0)

    def check(shape, **kwargs):
        k1, k2 = jax.random.split(jax.random.fold_in(key, shape[0] * shape[2] * shape[3]))
        logits = jax.random.normal(k1, shape, dtype=jnp.float32)
        targets = jax.random.uniform(k2, shape) > 0.5     # bool mask
        out = jax.block_until_ready(soft_dice_loss(logits, targets, **kwargs))
        ref = _soft_dice_loss_ref(
            logits, targets,
            smooth=kwargs.get("smooth", 1.0),
            reduction=kwargs.get("reduction", "mean"))
        assert jnp.allclose(out, ref, atol=1e-5, rtol=1e-4), (shape, out, ref)

    # Sub-1024 remainder -> minimal wrapper pad, single unmasked chunk.
    check((2, 1, 16, 16))
    # HW a multiple of 1024 -> no wrapper pad at all.
    check((2, 1, 32, 32))
    # Ragged multi-chunk path: rows=24, block_rows=16 -> masked tail chunk.
    check((2, 1, 48, 64), max_block_rows=16)
    # Per-sample reduction.
    check((3, 1, 16, 24), reduction="none")

    print("KERNEL_OK")
</pallas_src>

<mosaic_0001>
module attributes {stable_mosaic.version = 11 : i64} {
  func.func @_soft_dice_partials_kernel(%arg0: i32, %arg1: i32, %arg2: memref<1x8x128xf32, #tpu.memory_space<vmem>>, %arg3: memref<1x8x128xi8, #tpu.memory_space<vmem>>, %arg4: memref<1x8x128xf32, #tpu.memory_space<vmem>>, %arg5: memref<1x8x128xf32, #tpu.memory_space<vmem>>) attributes {dimension_semantics = [#tpu.dimension_semantics<parallel>, #tpu.dimension_semantics<arbitrary>], iteration_bounds = array<i64: 2, 1>, scalar_prefetch = 0 : i64, scratch_operands = 0 : i64, tpu.core_type = #tpu.core_type<tc>, window_params = [{transform_indices = @transform_0, window_bounds = array<i64: 1, 8, 128>}, {transform_indices = @transform_1, window_bounds = array<i64: 1, 8, 128>}, {transform_indices = @transform_2, window_bounds = array<i64: 1, 8, 128>}, {transform_indices = @transform_3, window_bounds = array<i64: 1, 8, 128>}]} {
    %c0_i32 = arith.constant 0 : i32
    %0 = arith.cmpi eq, %arg1, %c0_i32 : i32
    %1 = arith.extui %0 : i1 to i32
    %c0_i32_0 = arith.constant 0 : i32
    %2 = arith.cmpi ne, %1, %c0_i32_0 : i32
    scf.if %2 {
      %cst_22 = arith.constant 0.000000e+00 : f32
      %25 = vector.broadcast %cst_22 : f32 to vector<1x8x128xf32>
      %c0_23 = arith.constant 0 : index
      %c0_24 = arith.constant 0 : index
      %c0_25 = arith.constant 0 : index
      %26 = vector.load %arg4[%c0_23, %c0_24, %c0_25] : memref<1x8x128xf32, #tpu.memory_space<vmem>>, vector<1x8x128xf32>
      tpu.vector_store %arg4[%c0_23, %c0_24, %c0_25], %25 {strides = array<i32>} : memref<1x8x128xf32, #tpu.memory_space<vmem>>, vector<1x8x128xf32>,
      %cst_26 = arith.constant 0.000000e+00 : f32
      %27 = vector.broadcast %cst_26 : f32 to vector<1x8x128xf32>
      %c0_27 = arith.constant 0 : index
      %c0_28 = arith.constant 0 : index
      %c0_29 = arith.constant 0 : index
      %28 = vector.load %arg5[%c0_27, %c0_28, %c0_29] : memref<1x8x128xf32, #tpu.memory_space<vmem>>, vector<1x8x128xf32>
      tpu.vector_store %arg5[%c0_27, %c0_28, %c0_29], %27 {strides = array<i32>} : memref<1x8x128xf32, #tpu.memory_space<vmem>>, vector<1x8x128xf32>,
    } else {
    }
    %c0 = arith.constant 0 : index
    %c0_1 = arith.constant 0 : index
    %c0_2 = arith.constant 0 : index
    %3 = vector.load %arg2[%c0, %c0_1, %c0_2] : memref<1x8x128xf32, #tpu.memory_space<vmem>>, vector<1x8x128xf32>
    %c0_3 = arith.constant 0 : index
    %c0_4 = arith.constant 0 : index
    %c0_5 = arith.constant 0 : index
    %4 = vector.load %arg3[%c0_3, %c0_4, %c0_5] : memref<1x8x128xi8, #tpu.memory_space<vmem>>, vector<1x8x128xi8>
    %5 = arith.sitofp %4 : vector<1x8x128xi8> to vector<1x8x128xf32>
    %cst = arith.constant 5.000000e-01 : f32
    %6 = vector.broadcast %cst : f32 to vector<1x8x128xf32>
    %7 = arith.mulf %6, %3 : vector<1x8x128xf32>
    %8 = math.tanh %7 : vector<1x8x128xf32>
    %cst_6 = arith.constant 1.000000e+00 : f32
    %9 = vector.broadcast %cst_6 : f32 to vector<1x8x128xf32>
    %10 = arith.addf %8, %9 : vector<1x8x128xf32>
    %cst_7 = arith.constant 5.000000e-01 : f32
    %11 = vector.broadcast %cst_7 : f32 to vector<1x8x128xf32>
    %12 = arith.mulf %11, %10 : vector<1x8x128xf32>
    %c0_8 = arith.constant 0 : index
    %c0_9 = arith.constant 0 : index
    %c0_10 = arith.constant 0 : index
    %13 = vector.load %arg4[%c0_8, %c0_9, %c0_10] : memref<1x8x128xf32, #tpu.memory_space<vmem>>, vector<1x8x128xf32>
    %14 = arith.mulf %12, %5 : vector<1x8x128xf32>
    %15 = vector.shape_cast %14 : vector<1x8x128xf32> to vector<1x1x8x128xf32>
    %cst_11 = arith.constant dense<0.000000e+00> : vector<1x8x128xf32>
    %16 = vector.multi_reduction <add>, %15, %cst_11 [1] : vector<1x1x8x128xf32> to vector<1x8x128xf32>
    %17 = arith.addf %13, %16 : vector<1x8x128xf32>
    %c0_12 = arith.constant 0 : index
    %c0_13 = arith.constant 0 : index
    %c0_14 = arith.constant 0 : index
    %18 = vector.load %arg4[%c0_12, %c0_13, %c0_14] : memref<1x8x128xf32, #tpu.memory_space<vmem>>, vector<1x8x128xf32>
    tpu.vector_store %arg4[%c0_12, %c0_13, %c0_14], %17 {strides = array<i32>} : memref<1x8x128xf32, #tpu.memory_space<vmem>>, vector<1x8x128xf32>,
    %c0_15 = arith.constant 0 : index
    %c0_16 = arith.constant 0 : index
    %c0_17 = arith.constant 0 : index
    %19 = vector.load %arg5[%c0_15, %c0_16, %c0_17] : memref<1x8x128xf32, #tpu.memory_space<vmem>>, vector<1x8x128xf32>
    %20 = arith.addf %12, %5 : vector<1x8x128xf32>
    %21 = vector.shape_cast %20 : vector<1x8x128xf32> to vector<1x1x8x128xf32>
    %cst_18 = arith.constant dense<0.000000e+00> : vector<1x8x128xf32>
    %22 = vector.multi_reduction <add>, %21, %cst_18 [1] : vector<1x1x8x128xf32> to vector<1x8x128xf32>
    %23 = arith.addf %19, %22 : vector<1x8x128xf32>
    %c0_19 = arith.constant 0 : index
    %c0_20 = arith.constant 0 : index
    %c0_21 = arith.constant 0 : index
    %24 = vector.load %arg5[%c0_19, %c0_20, %c0_21] : memref<1x8x128xf32, #tpu.memory_space<vmem>>, vector<1x8x128xf32>
    tpu.vector_store %arg5[%c0_19, %c0_20, %c0_21], %23 {strides = array<i32>} : memref<1x8x128xf32, #tpu.memory_space<vmem>>, vector<1x8x128xf32>,
    return
  }
  func.func @transform_0(%arg0: i32, %arg1: i32) -> (i32, i32, i32) {
    %c0_i32 = arith.constant 0 : i32
    %c0_i32_0 = arith.constant 0 : i32
    return %arg0, %arg1, %c0_i32 : i32, i32, i32
  }
  func.func @transform_1(%arg0: i32, %arg1: i32) -> (i32, i32, i32) {
    %c0_i32 = arith.constant 0 : i32
    %c0_i32_0 = arith.constant 0 : i32
    return %arg0, %arg1, %c0_i32 : i32, i32, i32
  }
  func.func @transform_2(%arg0: i32, %arg1: i32) -> (i32, i32, i32) {
    %c0_i32 = arith.constant 0 : i32
    %c0_i32_0 = arith.constant 0 : i32
    %c0_i32_1 = arith.constant 0 : i32
    return %arg0, %c0_i32, %c0_i32_0 : i32, i32, i32
  }
  func.func @transform_3(%arg0: i32, %arg1: i32) -> (i32, i32, i32) {
    %c0_i32 = arith.constant 0 : i32
    %c0_i32_0 = arith.constant 0 : i32
    %c0_i32_1 = arith.constant 0 : i32
    return %arg0, %c0_i32, %c0_i32_0 : i32, i32, i32
  }
}

</mosaic_0001>

<bundles_post_ra>
// kernel: soft_dice_loss.1
= control target key start
LH: loop header
LB: loop body
LE: loop exit
PB: predicated region body
PF: predicated region fallthrough
CT: control target
= control target key end

     0   :  { %s444_s12 = smov 0   ;;  %s446_s13 = smov 0   ;;  %s480_s0 = inlined_call_operand.vmem [shape: f32[2,8,128], index: 0, kind: input, shape index: {}]   ;;  %s481_s1 = inlined_call_operand.vmem [shape: s8[2,8,128], index: 1, kind: input, shape index: {}]   ;;  %s482_s2 = inlined_call_operand.vmem [shape: f32[2,8,128], index: 2, kind: output, shape index: {0}]   ;;  %s483_s3 = inlined_call_operand.vmem [shape: f32[2,8,128], index: 3, kind: output, shape index: {1}]  }
   0x1   :  { %s448_s14 = smov 0  }
   0x2 LB: > { %s26_s15 = sadd.s32 1, %s418_s13  ;;  %p366_p0 = scmp.ge.s32.totalorder %s422_s14, 1  ;;  %s422_s14 = sphi %s448_s14, %s14_s14   ;;  %s418_s13 = sphi %s446_s13, %s485_s13   ;;  %s414_s12 = sphi %s444_s12, %s484_s12  }
   0x3   : > { %p28_p1 = scmp.ge.s32.totalorder %s26_s15, 2  ;;  %p170_p2 = scmp.lt.s32.totalorder %s422_s14, 3 }
   0x5   : > { %s487_s15 = smov (%p28_p1, %s26_s15), 0  ;;  %p171_p3 = pnand %p366_p0, %p170_p2 }
   0x6   : > { %p206_p4 = scmp.lt.s32.totalorder (!%p171_p3), %s414_s12, 1 }
   0x7   : > { %174 = sbr.rel (%p171_p3) target bundleno = 38 (0x26), region = 28 }
   0xe   : > { %s489_s12 = smov (!%p206_p4, %s414_s12), 1 }
   0xf   : > { %s367_s16 = sshll.u32 %s489_s12, 3  ;;  %s368_s20 = sshll.u32 %s489_s12, 1 }
  0x10   : > { %s212_s19 = scalar_lea.vmem %s480_s0, %s367_s16  ;;  %s219_s23 = scalar_lea.vmem %s481_s1, %s368_s20 }
  0x11   : > { %v234_v0 = vld [vmem:[%s212_s19] sm:$0xff]  ;;  %s223_s26 = scalar_lea.vmem %s482_s2, %s367_s16  ;;  %s227_s29 = scalar_lea.vmem %s483_s3, %s367_s16 }
  0x12   : > { %v238_v1 = vmul.f32 0.5, %v234_v0  ;;  %v235_v2 = vld [vmem:[%s219_s23] sm:$0x3] }
  0x13   : > { %v236_v3 = vunpack.c.0.s8 %v235_v2 }
  0x14   : > { %398 = vtanh.f32 %v238_v1 }
  0x15   : > { %v237_v5 = vcvt.s32.f32 %v236_v3 }
  0x1e   : > { %v399_v4 = vpop.eup %398 }
  0x1f   : > { %v240_v6 = vadd.f32 1.0, %v399_v4 }
  0x21   : > { %v241_v7 = vmul.f32 0.5, %v240_v6 }
  0x23   : > { %v243_v8 = vmul.f32 %v241_v7, %v237_v5  ;;  %v248_v9 = vadd.f32 %v241_v7, %v237_v5 }
  0x25   : > { %246 = vst [vmem:[%s223_s26] sm:$0xff] %v243_v8  ;;  %251 = vst [vmem:[%s227_s29] sm:$0xff] %v248_v9 }
  0x26 PF: > { %s14_s14 = sadd.s32 1, %s422_s14   ;;  %s484_s12 = smov %s418_s13 }
  0x27   : > { %p11_p5 = scmp.ge.s32.totalorder %s14_s14, 4   ;;  %s485_s13 = smov %s487_s15 }
  0x29   :  { %13 = sbr.rel (!%p11_p5) target bundleno = 2 (0x2), region = 77 }

</bundles_post_ra>
